<compile_context>
chip_gen: v6e
topology: v6e:2x2x1
jax: 0.10.0
libtpu: 0.0.40
codegen_flags: <defaults>
</compile_context>

<pallas_src>
import functools

import jax
import jax.numpy as jnp
from jax import lax
from jax.experimental import pallas as pl
from jax.experimental.pallas import tpu as pltpu


def _vgg_block_kernel(x_ref, *refs, n_layers, stride, neg_slope,
                      N, H, W, C_in, C_out, H_out, W_out, n_act):
    """Fused VGG block: n_layers x (3x3 conv + LeakyReLU), stride on the last conv.

    Lane-collapsed layouts (channels folded into the minor/lane dim):
      x_ref              : (N, H,   W*C_in)             bf16, unpadded input
      t_refs[3*i + dy]   : (W*Cin_i, Wout_i*C_out)      bf16, block-Toeplitz weights
      o_ref              : (N, H_out, W_out*C_out)      f32,  strided output
      xpad_ref           : (N, H+2, W*C_in)             bf16, H-halo input scratch
      act_refs[j]        : (N, H+2, W*C_out)            bf16, H-halo activations (ping-pong)
    """
    t_refs = refs[:3 * n_layers]
    o_ref = refs[3 * n_layers]
    xpad_ref = refs[3 * n_layers + 1]
    act_refs = refs[3 * n_layers + 2:]

    def conv3x3(in_ref, t3):
        # 3 lane-dense MXU matmuls (one per dy tap), f32 accumulation, LeakyReLU in f32.
        L = in_ref.shape[-1]
        acc = None
        for dy in range(3):
            lhs = in_ref[:, dy:dy + H, :].reshape(N * H, L)          # contiguous rows
            p = jnp.dot(lhs, t3[dy][...], preferred_element_type=jnp.float32)
            acc = p if acc is None else acc + p                      # (N*H, Wout*C_out) f32
        return jnp.where(acc > 0, acc, neg_slope * acc)

    # Input halo: zero only the two border rows (interior is fully overwritten).
    # W-padding is folded into the Toeplitz weights, so no lane border is needed.
    zrow_in = jnp.zeros((N, 1, W * C_in), xpad_ref.dtype)
    xpad_ref[:, 0:1, :] = zrow_in
    xpad_ref[:, H + 1:H + 2, :] = zrow_in
    xpad_ref[:, 1:H + 1, :] = x_ref[...]

    # Stride-1 layers: intermediates stay in VMEM, lane-dense bf16.
    cur = xpad_ref
    for i in range(n_layers - 1):
        y = conv3x3(cur, t_refs[3 * i:3 * i + 3])                    # (N*H, W*C_out) f32
        a_ref = act_refs[i % n_act]
        if i < n_act:  # first use of this buffer: zero its halo rows once; they stay zero
            zrow = jnp.zeros((N, 1, W * C_out), a_ref.dtype)
            a_ref[:, 0:1, :] = zrow
            a_ref[:, H + 1:H + 2, :] = zrow
        a_ref[:, 1:H + 1, :] = y.reshape(N, H, W * C_out).astype(a_ref.dtype)
        cur = a_ref

    # Final layer: columns already subsampled by the strided Toeplitz weights; rows
    # subsampled here (exact for k=3, pad=1) before the single lane-dense HBM store.
    y = conv3x3(cur, t_refs[3 * (n_layers - 1):3 * n_layers])        # (N*H, W_out*C_out) f32
    if stride > 1:
        wc = W_out * C_out
        y = y.reshape(N * H_out, stride, wc)[:, :1, :].reshape(N * H_out, wc)
    o_ref[...] = y.reshape(N, H_out, W_out * C_out).astype(o_ref.dtype)


def _build_toeplitz(w_hwio, W, stride):
    """(3,3,Cin,Cout) HWIO conv weights -> 3 block-Toeplitz matrices, one per dy tap.

    Each matrix is (W*Cin, W_out*Cout) bf16; the dx taps, pad=1 W-padding and the column
    stride are folded in so each conv layer becomes 3 plain lane-dense matmuls in-kernel.
    """
    k = w_hwio.shape[0]
    c_in, c_out = w_hwio.shape[2], w_hwio.shape[3]
    w_out = (W + 2 - k) // stride + 1
    wo_idx = jnp.arange(w_out)
    mats = []
    for dy in range(k):
        blocks = jnp.zeros((W + 2, w_out, c_in, c_out), jnp.float32)
        for dx in range(k):
            blocks = blocks.at[wo_idx * stride + dx, wo_idx].set(
                w_hwio[dy, dx].astype(jnp.float32))
        t = blocks[1:W + 1]                                   # drop the zero-pad input pixels
        t = jnp.transpose(t, (0, 2, 1, 3)).reshape(W * c_in, w_out * c_out)
        mats.append(t.astype(jnp.bfloat16))
    return mats


def vggnet_block_forward(x_nchw, weights, stride=1, negative_slope=0.1):
    """VGGNetBlock forward. Input/output follow the PyTorch NCHW convention.

    weights: list of HWIO (3, 3, Cin, Cout) float arrays, one per conv layer (bias=False).
    """
    n_layers = len(weights)
    C_out = weights[0].shape[-1]
    N, C_in, H, W = x_nchw.shape
    assert H % stride == 0, "fused strided-row path requires H divisible by stride"
    H_out = (H - 1) // stride + 1
    W_out = (W - 1) // stride + 1

    # NCHW -> lane-collapsed (N, H, W*C) bf16, once at the module boundary.
    x = jnp.transpose(x_nchw, (0, 2, 3, 1)).astype(jnp.bfloat16).reshape(N, H, W * C_in)

    # Block-Toeplitz weights: 3 per layer (one per dy tap); stride folded into the last layer's.
    t_mats = []
    for li, w in enumerate(weights):
        s = stride if li == n_layers - 1 else 1
        t_mats += _build_toeplitz(w, W, s)

    n_act = min(max(n_layers - 1, 0), 2)
    kernel = functools.partial(
        _vgg_block_kernel, n_layers=n_layers, stride=stride, neg_slope=negative_slope,
        N=N, H=H, W=W, C_in=C_in, C_out=C_out, H_out=H_out, W_out=W_out, n_act=n_act)

    in_specs = [pl.BlockSpec((N, H, W * C_in), lambda i: (0, 0, 0))]
    in_specs += [pl.BlockSpec(t.shape, lambda i: (0, 0)) for t in t_mats]

    scratch_shapes = [pltpu.VMEM((N, H + 2, W * C_in), jnp.bfloat16)]
    scratch_shapes += [pltpu.VMEM((N, H + 2, W * C_out), jnp.bfloat16) for _ in range(n_act)]

    out = pl.pallas_call(
        kernel,
        out_shape=jax.ShapeDtypeStruct((N, H_out, W_out * C_out), jnp.float32),
        grid=(1,),  # whole batch folded into the matmul M dimension: one MXU-friendly step
        in_specs=in_specs,
        out_specs=pl.BlockSpec((N, H_out, W_out * C_out), lambda i: (0, 0, 0)),
        scratch_shapes=scratch_shapes,
        compiler_params=pltpu.CompilerParams(
            dimension_semantics=("arbitrary",),
            vmem_limit_bytes=32 * 1024 * 1024),
    )(x, *t_mats)

    out = out.reshape(N, H_out, W_out, C_out)
    return jnp.transpose(out, (0, 3, 1, 2))  # lane-dense slab -> NCHW at the boundary


def init_vggnet_block_params(key, in_channels, out_channels, n_convolution):
    """Deterministic kaiming_uniform-style init, HWIO weight layout, bias=False."""
    weights = []
    c_in = in_channels
    for _ in range(n_convolution):
        key, sub = jax.random.split(key)
        fan_in = c_in * 3 * 3
        bound = 1.0 / jnp.sqrt(jnp.float32(fan_in))
        w = jax.random.uniform(sub, (3, 3, c_in, out_channels),
                               dtype=jnp.float32, minval=-bound, maxval=bound)
        weights.append(w)
        c_in = out_channels
    return weights


def _reference_forward(x_nchw, weights, stride=1, negative_slope=0.1):
    """Pure-JAX reference (lax.conv) with the same bf16-operand / f32-accum math."""
    x = x_nchw.astype(jnp.bfloat16)
    n_layers = len(weights)
    for i, w in enumerate(weights):
        s = stride if i == n_layers - 1 else 1
        y = lax.conv_general_dilated(
            x, w.astype(jnp.bfloat16), window_strides=(s, s),
            padding=[(1, 1), (1, 1)],
            dimension_numbers=("NCHW", "HWIO", "NCHW"),
            preferred_element_type=jnp.float32)
        y = jnp.where(y > 0, y, negative_slope * y)
        x = y if i == n_layers - 1 else y.astype(jnp.bfloat16)
    return x


if __name__ == "__main__":
    def run_case(key, N, C_in, H, W, C_out, n_conv, stride):
        key, xk = jax.random.split(key)
        x = jax.random.normal(xk, (N, C_in, H, W), dtype=jnp.float32)
        weights = init_vggnet_block_params(key, C_in, C_out, n_conv)
        out = jax.block_until_ready(vggnet_block_forward(x, weights, stride=stride))
        ref = _reference_forward(x, weights, stride=stride)
        H_out, W_out = (H - 1) // stride + 1, (W - 1) // stride + 1
        assert out.shape == (N, C_out, H_out, W_out), out.shape
        err = float(jnp.max(jnp.abs(out - ref)))
        assert jnp.allclose(out, ref, atol=1e-3, rtol=1e-3), f"mismatch, max err {err}"

    key = jax.random.PRNGKey(0)
    k1, k2 = jax.random.split(key)
    # VGGNetBlock(4, 8, n_convolution=2, stride=2) — default LeakyReLU(0.1), no norm, bias=False
    run_case(k1, N=2, C_in=4, H=16, W=16, C_out=8, n_conv=2, stride=2)
    # VGGNetBlock(3, 16, n_convolution=3, stride=1)
    run_case(k2, N=1, C_in=3, H=8, W=8, C_out=16, n_conv=3, stride=1)

    print("KERNEL_OK")
</pallas_src>

<mosaic_0001>
module attributes {stable_mosaic.version = 11 : i64} {
  func.func @_vgg_block_kernel(%arg0: i32, %arg1: memref<2x16x64xbf16, #tpu.memory_space<vmem>>, %arg2: memref<64x128xbf16, #tpu.memory_space<vmem>>, %arg3: memref<64x128xbf16, #tpu.memory_space<vmem>>, %arg4: memref<64x128xbf16, #tpu.memory_space<vmem>>, %arg5: memref<128x64xbf16, #tpu.memory_space<vmem>>, %arg6: memref<128x64xbf16, #tpu.memory_space<vmem>>, %arg7: memref<128x64xbf16, #tpu.memory_space<vmem>>, %arg8: memref<2x8x64xf32, #tpu.memory_space<vmem>>, %arg9: memref<2x18x64xbf16, #tpu.memory_space<vmem>>, %arg10: memref<2x18x128xbf16, #tpu.memory_space<vmem>>) attributes {dimension_semantics = [#tpu.dimension_semantics<arbitrary>], iteration_bounds = array<i64: 1>, scalar_prefetch = 0 : i64, scratch_operands = 2 : i64, tpu.core_type = #tpu.core_type<tc>, window_params = [{pipeline_mode = #tpu.pipeline_mode<synchronous>, transform_indices = @transform_0, window_bounds = array<i64: 2, 16, 64>}, {pipeline_mode = #tpu.pipeline_mode<synchronous>, transform_indices = @transform_1, window_bounds = array<i64: 64, 128>}, {pipeline_mode = #tpu.pipeline_mode<synchronous>, transform_indices = @transform_2, window_bounds = array<i64: 64, 128>}, {pipeline_mode = #tpu.pipeline_mode<synchronous>, transform_indices = @transform_3, window_bounds = array<i64: 64, 128>}, {pipeline_mode = #tpu.pipeline_mode<synchronous>, transform_indices = @transform_4, window_bounds = array<i64: 128, 64>}, {pipeline_mode = #tpu.pipeline_mode<synchronous>, transform_indices = @transform_5, window_bounds = array<i64: 128, 64>}, {pipeline_mode = #tpu.pipeline_mode<synchronous>, transform_indices = @transform_6, window_bounds = array<i64: 128, 64>}, {pipeline_mode = #tpu.pipeline_mode<synchronous>, transform_indices = @transform_7, window_bounds = array<i64: 2, 8, 64>}]} {
    %cst = arith.constant 0.000000e+00 : bf16
    %0 = vector.broadcast %cst : bf16 to vector<2x1x64xbf16>
    %c0 = arith.constant 0 : index
    %c0_0 = arith.constant 0 : index
    %c0_1 = arith.constant 0 : index
    %1 = vector.load %arg9[%c0, %c0_0, %c0_1] : memref<2x18x64xbf16, #tpu.memory_space<vmem>>, vector<2x1x64xbf16>
    tpu.vector_store %arg9[%c0, %c0_0, %c0_1], %0 {strides = array<i32>} : memref<2x18x64xbf16, #tpu.memory_space<vmem>>, vector<2x1x64xbf16>,
    %c0_2 = arith.constant 0 : index
    %c17 = arith.constant 17 : index
    %c0_3 = arith.constant 0 : index
    %2 = vector.load %arg9[%c0_2, %c17, %c0_3] : memref<2x18x64xbf16, #tpu.memory_space<vmem>>, vector<2x1x64xbf16>
    tpu.vector_store %arg9[%c0_2, %c17, %c0_3], %0 {strides = array<i32>} : memref<2x18x64xbf16, #tpu.memory_space<vmem>>, vector<2x1x64xbf16>,
    %c0_4 = arith.constant 0 : index
    %c0_5 = arith.constant 0 : index
    %c0_6 = arith.constant 0 : index
    %3 = vector.load %arg1[%c0_4, %c0_5, %c0_6] : memref<2x16x64xbf16, #tpu.memory_space<vmem>>, vector<2x16x64xbf16>
    %c0_7 = arith.constant 0 : index
    %c1 = arith.constant 1 : index
    %c0_8 = arith.constant 0 : index
    %4 = vector.load %arg9[%c0_7, %c1, %c0_8] : memref<2x18x64xbf16, #tpu.memory_space<vmem>>, vector<2x16x64xbf16>
    tpu.vector_store %arg9[%c0_7, %c1, %c0_8], %3 {strides = array<i32>} : memref<2x18x64xbf16, #tpu.memory_space<vmem>>, vector<2x16x64xbf16>,
    %c0_9 = arith.constant 0 : index
    %c0_10 = arith.constant 0 : index
    %c0_11 = arith.constant 0 : index
    %5 = vector.load %arg9[%c0_9, %c0_10, %c0_11] : memref<2x18x64xbf16, #tpu.memory_space<vmem>>, vector<2x16x64xbf16>
    %6 = vector.shape_cast %5 : vector<2x16x64xbf16> to vector<32x64xbf16>
    %c0_12 = arith.constant 0 : index
    %c0_13 = arith.constant 0 : index
    %7 = vector.load %arg2[%c0_12, %c0_13] : memref<64x128xbf16, #tpu.memory_space<vmem>>, vector<64x128xbf16>
    %cst_14 = arith.constant dense<0.000000e+00> : vector<32x128xf32>
    %8 = tpu.matmul %6, %7, %cst_14 {dimension_numbers = #tpu.dot_dimension_numbers<[1], [0], [0], [1], [0, 0, 1, 1], [], []>} : vector<32x64xbf16>, vector<64x128xbf16>, vector<32x128xf32> -> vector<32x128xf32>
    %c0_15 = arith.constant 0 : index
    %c1_16 = arith.constant 1 : index
    %c0_17 = arith.constant 0 : index
    %9 = vector.load %arg9[%c0_15, %c1_16, %c0_17] : memref<2x18x64xbf16, #tpu.memory_space<vmem>>, vector<2x16x64xbf16>
    %10 = vector.shape_cast %9 : vector<2x16x64xbf16> to vector<32x64xbf16>
    %c0_18 = arith.constant 0 : index
    %c0_19 = arith.constant 0 : index
    %11 = vector.load %arg3[%c0_18, %c0_19] : memref<64x128xbf16, #tpu.memory_space<vmem>>, vector<64x128xbf16>
    %cst_20 = arith.constant dense<0.000000e+00> : vector<32x128xf32>
    %12 = tpu.matmul %10, %11, %cst_20 {dimension_numbers = #tpu.dot_dimension_numbers<[1], [0], [0], [1], [0, 0, 1, 1], [], []>} : vector<32x64xbf16>, vector<64x128xbf16>, vector<32x128xf32> -> vector<32x128xf32>
    %13 = arith.addf %8, %12 : vector<32x128xf32>
    %c0_21 = arith.constant 0 : index
    %c2 = arith.constant 2 : index
    %c0_22 = arith.constant 0 : index
    %14 = vector.load %arg9[%c0_21, %c2, %c0_22] : memref<2x18x64xbf16, #tpu.memory_space<vmem>>, vector<2x16x64xbf16>
    %15 = vector.shape_cast %14 : vector<2x16x64xbf16> to vector<32x64xbf16>
    %c0_23 = arith.constant 0 : index
    %c0_24 = arith.constant 0 : index
    %16 = vector.load %arg4[%c0_23, %c0_24] : memref<64x128xbf16, #tpu.memory_space<vmem>>, vector<64x128xbf16>
    %cst_25 = arith.constant dense<0.000000e+00> : vector<32x128xf32>
    %17 = tpu.matmul %15, %16, %cst_25 {dimension_numbers = #tpu.dot_dimension_numbers<[1], [0], [0], [1], [0, 0, 1, 1], [], []>} : vector<32x64xbf16>, vector<64x128xbf16>, vector<32x128xf32> -> vector<32x128xf32>
    %18 = arith.addf %13, %17 : vector<32x128xf32>
    %cst_26 = arith.constant 0.000000e+00 : f32
    %19 = vector.broadcast %cst_26 : f32 to vector<32x128xf32>
    %20 = arith.cmpf ogt, %18, %19 : vector<32x128xf32>
    %cst_27 = arith.constant 1.000000e-01 : f32
    %21 = vector.broadcast %cst_27 : f32 to vector<32x128xf32>
    %22 = arith.mulf %21, %18 : vector<32x128xf32>
    %23 = arith.select %20, %18, %22 : vector<32x128xi1>, vector<32x128xf32>
    %cst_28 = arith.constant 0.000000e+00 : bf16
    %24 = vector.broadcast %cst_28 : bf16 to vector<2x1x128xbf16>
    %c0_29 = arith.constant 0 : index
    %c0_30 = arith.constant 0 : index
    %c0_31 = arith.constant 0 : index
    %25 = vector.load %arg10[%c0_29, %c0_30, %c0_31] : memref<2x18x128xbf16, #tpu.memory_space<vmem>>, vector<2x1x128xbf16>
    tpu.vector_store %arg10[%c0_29, %c0_30, %c0_31], %24 {strides = array<i32>} : memref<2x18x128xbf16, #tpu.memory_space<vmem>>, vector<2x1x128xbf16>,
    %c0_32 = arith.constant 0 : index
    %c17_33 = arith.constant 17 : index
    %c0_34 = arith.constant 0 : index
    %26 = vector.load %arg10[%c0_32, %c17_33, %c0_34] : memref<2x18x128xbf16, #tpu.memory_space<vmem>>, vector<2x1x128xbf16>
    tpu.vector_store %arg10[%c0_32, %c17_33, %c0_34], %24 {strides = array<i32>} : memref<2x18x128xbf16, #tpu.memory_space<vmem>>, vector<2x1x128xbf16>,
    %27 = vector.shape_cast %23 : vector<32x128xf32> to vector<2x16x128xf32>
    %28 = arith.truncf %27 : vector<2x16x128xf32> to vector<2x16x128xbf16>
    %c0_35 = arith.constant 0 : index
    %c1_36 = arith.constant 1 : index
    %c0_37 = arith.constant 0 : index
    %29 = vector.load %arg10[%c0_35, %c1_36, %c0_37] : memref<2x18x128xbf16, #tpu.memory_space<vmem>>, vector<2x16x128xbf16>
    tpu.vector_store %arg10[%c0_35, %c1_36, %c0_37], %28 {strides = array<i32>} : memref<2x18x128xbf16, #tpu.memory_space<vmem>>, vector<2x16x128xbf16>,
    %c0_38 = arith.constant 0 : index
    %c0_39 = arith.constant 0 : index
    %c0_40 = arith.constant 0 : index
    %30 = vector.load %arg10[%c0_38, %c0_39, %c0_40] : memref<2x18x128xbf16, #tpu.memory_space<vmem>>, vector<2x16x128xbf16>
    %31 = vector.shape_cast %30 : vector<2x16x128xbf16> to vector<32x128xbf16>
    %c0_41 = arith.constant 0 : index
    %c0_42 = arith.constant 0 : index
    %32 = vector.load %arg5[%c0_41, %c0_42] : memref<128x64xbf16, #tpu.memory_space<vmem>>, vector<128x64xbf16>
    %cst_43 = arith.constant dense<0.000000e+00> : vector<32x64xf32>
    %33 = tpu.matmul %31, %32, %cst_43 {dimension_numbers = #tpu.dot_dimension_numbers<[1], [0], [0], [1], [0, 0, 1, 1], [], []>} : vector<32x128xbf16>, vector<128x64xbf16>, vector<32x64xf32> -> vector<32x64xf32>
    %c0_44 = arith.constant 0 : index
    %c1_45 = arith.constant 1 : index
    %c0_46 = arith.constant 0 : index
    %34 = vector.load %arg10[%c0_44, %c1_45, %c0_46] : memref<2x18x128xbf16, #tpu.memory_space<vmem>>, vector<2x16x128xbf16>
    %35 = vector.shape_cast %34 : vector<2x16x128xbf16> to vector<32x128xbf16>
    %c0_47 = arith.constant 0 : index
    %c0_48 = arith.constant 0 : index
    %36 = vector.load %arg6[%c0_47, %c0_48] : memref<128x64xbf16, #tpu.memory_space<vmem>>, vector<128x64xbf16>
    %cst_49 = arith.constant dense<0.000000e+00> : vector<32x64xf32>
    %37 = tpu.matmul %35, %36, %cst_49 {dimension_numbers = #tpu.dot_dimension_numbers<[1], [0], [0], [1], [0, 0, 1, 1], [], []>} : vector<32x128xbf16>, vector<128x64xbf16>, vector<32x64xf32> -> vector<32x64xf32>
    %38 = arith.addf %33, %37 : vector<32x64xf32>
    %c0_50 = arith.constant 0 : index
    %c2_51 = arith.constant 2 : index
    %c0_52 = arith.constant 0 : index
    %39 = vector.load %arg10[%c0_50, %c2_51, %c0_52] : memref<2x18x128xbf16, #tpu.memory_space<vmem>>, vector<2x16x128xbf16>
    %40 = vector.shape_cast %39 : vector<2x16x128xbf16> to vector<32x128xbf16>
    %c0_53 = arith.constant 0 : index
    %c0_54 = arith.constant 0 : index
    %41 = vector.load %arg7[%c0_53, %c0_54] : memref<128x64xbf16, #tpu.memory_space<vmem>>, vector<128x64xbf16>
    %cst_55 = arith.constant dense<0.000000e+00> : vector<32x64xf32>
    %42 = tpu.matmul %40, %41, %cst_55 {dimension_numbers = #tpu.dot_dimension_numbers<[1], [0], [0], [1], [0, 0, 1, 1], [], []>} : vector<32x128xbf16>, vector<128x64xbf16>, vector<32x64xf32> -> vector<32x64xf32>
    %43 = arith.addf %38, %42 : vector<32x64xf32>
    %cst_56 = arith.constant 0.000000e+00 : f32
    %44 = vector.broadcast %cst_56 : f32 to vector<32x64xf32>
    %45 = arith.cmpf ogt, %43, %44 : vector<32x64xf32>
    %cst_57 = arith.constant 1.000000e-01 : f32
    %46 = vector.broadcast %cst_57 : f32 to vector<32x64xf32>
    %47 = arith.mulf %46, %43 : vector<32x64xf32>
    %48 = arith.select %45, %43, %47 : vector<32x64xi1>, vector<32x64xf32>
    %49 = vector.shape_cast %48 : vector<32x64xf32> to vector<16x2x64xf32>
    %50 = vector.extract_strided_slice %49 {offsets = [0, 0, 0], sizes = [16, 1, 64], strides = [1, 1, 1]} : vector<16x2x64xf32> to vector<16x1x64xf32>
    %51 = vector.shape_cast %50 : vector<16x1x64xf32> to vector<16x64xf32>
    %52 = vector.shape_cast %51 : vector<16x64xf32> to vector<2x8x64xf32>
    %c0_58 = arith.constant 0 : index
    %c0_59 = arith.constant 0 : index
    %c0_60 = arith.constant 0 : index
    %53 = vector.load %arg8[%c0_58, %c0_59, %c0_60] : memref<2x8x64xf32, #tpu.memory_space<vmem>>, vector<2x8x64xf32>
    tpu.vector_store %arg8[%c0_58, %c0_59, %c0_60], %52 {strides = array<i32>} : memref<2x8x64xf32, #tpu.memory_space<vmem>>, vector<2x8x64xf32>,
    return
  }
  func.func @transform_0(%arg0: i32) -> (i32, i32, i32) {
    %c0_i32 = arith.constant 0 : i32
    %c0_i32_0 = arith.constant 0 : i32
    %c0_i32_1 = arith.constant 0 : i32
    %c0_i32_2 = arith.constant 0 : i32
    return %c0_i32, %c0_i32_0, %c0_i32_1 : i32, i32, i32
  }
  func.func @transform_1(%arg0: i32) -> (i32, i32) {
    %c0_i32 = arith.constant 0 : i32
    %c0_i32_0 = arith.constant 0 : i32
    %c0_i32_1 = arith.constant 0 : i32
    return %c0_i32, %c0_i32_0 : i32, i32
  }
  func.func @transform_2(%arg0: i32) -> (i32, i32) {
    %c0_i32 = arith.constant 0 : i32
    %c0_i32_0 = arith.constant 0 : i32
    %c0_i32_1 = arith.constant 0 : i32
    return %c0_i32, %c0_i32_0 : i32, i32
  }
  func.func @transform_3(%arg0: i32) -> (i32, i32) {
    %c0_i32 = arith.constant 0 : i32
    %c0_i32_0 = arith.constant 0 : i32
    %c0_i32_1 = arith.constant 0 : i32
    return %c0_i32, %c0_i32_0 : i32, i32
  }
  func.func @transform_4(%arg0: i32) -> (i32, i32) {
    %c0_i32 = arith.constant 0 : i32
    %c0_i32_0 = arith.constant 0 : i32
    %c0_i32_1 = arith.constant 0 : i32
    return %c0_i32, %c0_i32_0 : i32, i32
  }
  func.func @transform_5(%arg0: i32) -> (i32, i32) {
    %c0_i32 = arith.constant 0 : i32
    %c0_i32_0 = arith.constant 0 : i32
    %c0_i32_1 = arith.constant 0 : i32
    return %c0_i32, %c0_i32_0 : i32, i32
  }
  func.func @transform_6(%arg0: i32) -> (i32, i32) {
    %c0_i32 = arith.constant 0 : i32
    %c0_i32_0 = arith.constant 0 : i32
    %c0_i32_1 = arith.constant 0 : i32
    return %c0_i32, %c0_i32_0 : i32, i32
  }
  func.func @transform_7(%arg0: i32) -> (i32, i32, i32) {
    %c0_i32 = arith.constant 0 : i32
    %c0_i32_0 = arith.constant 0 : i32
    %c0_i32_1 = arith.constant 0 : i32
    %c0_i32_2 = arith.constant 0 : i32
    return %c0_i32, %c0_i32_0, %c0_i32_1 : i32, i32, i32
  }
}

</mosaic_0001>

<bundles_post_ra>
// kernel: tpu_custom_call.1
= control target key start
LH: loop header
LB: loop body
LE: loop exit
PB: predicated region body
PF: predicated region fallthrough
CT: control target
= control target key end

     0   :  { %vm28_vm0 = vcmask 516096   ;;  %vm91_vm1 = vcmask 519168   ;;  %vm29_vm2 = vsmask.f32 256  ;;  %v31_v8 = vld [vmem:[#allocation2] sm:$0x1]  ;;  %s1831_s0 = inlined_call_operand.vmem [shape: bf16[2,16,64], index: 0, kind: input, shape index: {}]   ;;  %s1832_s1 = inlined_call_operand.vmem [shape: bf16[64,128], index: 1, kind: input, shape index: {}]   ;;  %s1833_s2 = inlined_call_operand.vmem [shape: bf16[64,128], index: 2, kind: input, shape index: {}]   ;;  %s1834_s3 = inlined_call_operand.vmem [shape: bf16[64,128], index: 3, kind: input, shape index: {}]   ;;  %s1835_s4 = inlined_call_operand.vmem [shape: bf16[128,64], index: 4, kind: input, shape index: {}]   ;;  %s1836_s5 = inlined_call_operand.vmem [shape: bf16[128,64], index: 5, kind: input, shape index: {}]   ;;  %s1837_s6 = inlined_call_operand.vmem [shape: bf16[128,64], index: 6, kind: input, shape index: {}]   ;;  %s1838_s7 = inlined_call_operand.hbm [shape: f32[2,8,64], index: 7, kind: output, shape index: {}]  }
   0x1   :  { %v1419_v0 = vld [vmem:[%s1833_s2 + $0x18] sm:$0xff]   ;;  %v1421_v2 = vld [vmem:[%s1833_s2 + $0x10] sm:$0xff]   ;;  %v1423_v4 = vld [vmem:[%s1833_s2 + $0x8] sm:$0xff]   ;;  %vm37_vm4 = vsmask.f32 7938  ;;  %vm211_vm9 = vcmask 523264  }
   0x2   :  { %v1420_v1 = vld [vmem:[%s1832_s1 + $0x18] sm:$0xff]   ;;  %1319 = vmatprep.subr.bf16.mxu0 %v1419_v0  ;;  %v1422_v3 = vld [vmem:[%s1832_s1 + $0x10] sm:$0xff]   ;;  %v1424_v5 = vld [vmem:[%s1832_s1 + $0x8] sm:$0xff]   ;;  %vm49_vm6 = vsmask.f32 4368  ;;  %vm362_vm12 = vcmask 1042432  }
   0x3   :  { %1320 = vmatpush3.bf16.msra.mxu0 %v1419_v0  ;;  %1331 = vmatprep.subr.bf16.mxu1 %v1420_v1  ;;  %v1425_v6 = vld [vmem:[%s1833_s2] sm:$0xff]   ;;  %v34_v9 = vld [vmem:[#allocation2 + $0xc] sm:$0x1]  ;;  %vm1551_vm3 = vmand %vm28_vm0, %vm29_vm2  ;;  %vm122_vm10 = vsmask.f32 3328  ;;  %vm363_vm13 = vcmask 1046532  }
   0x4   :  { %1332 = vmatpush3.bf16.msra.mxu1 %v1420_v1  ;;  %1321 = vmatprep.subr.bf16.mxu0 %v1421_v2  ;;  %v1426_v7 = vld [vmem:[%s1832_s1] sm:$0xff]   ;;  %v39_v11 = vld [vmem:[#allocation2 + $0x8] sm:$0x1]  ;;  %v42_v12 = vld [vmem:[#allocation2 + $0x14] sm:$0x1]  ;;  %v32_v13 = vsel %vm1551_vm3, 0, %v31_v8 }
   0x5   :  { %1333 = vmatprep.subr.bf16.mxu1 %v1422_v3  ;;  %v35_v14 = vsel %vm1551_vm3, 0, %v34_v9  ;;  %vm38_vm5 = vmand %vm28_vm0, %vm37_vm4  ;;  %v45_v15 = vld [vmem:[%s1831_s0] sm:$0xf]  ;;  %v46_v16 = vld [vmem:[%s1831_s0 + $0x4] sm:$0xf] }
   0x6   :  { %33 = vst [vmem:[#allocation2] sm:$0x1] %v32_v13  ;;  %36 = vst [vmem:[#allocation2 + $0xc] sm:$0x1] %v35_v14  ;;  %v40_v17 = vsel %vm38_vm5, 0, %v39_v11  ;;  %v43_v18 = vsel %vm38_vm5, 0, %v42_v12 }
   0x7   :  { %1322 = vmatpush3.bf16.msra.mxu0 %v1421_v2  ;;  %v47_v19 = vld [vmem:[%s1831_s0 + $0x8] sm:$0xf]  ;;  %v48_v20 = vld [vmem:[%s1831_s0 + $0xc] sm:$0xf]  ;;  %41 = vst [vmem:[#allocation2 + $0x8] sm:$0x1] %v40_v17  ;;  %vm1579_vm7 = vmor %vm29_vm2, %vm49_vm6 }
   0x8   :  { %1334 = vmatpush3.bf16.msra.mxu1 %v1422_v3  ;;  %1323 = vmatprep.subr.bf16.mxu0 %v1423_v4  ;;  %44 = vst [vmem:[#allocation2 + $0x14] sm:$0x1] %v43_v18  ;;  %v52_v21 = vshrl.u32 %v45_v15, 16  ;;  %v55_v22 = vshll.u32 %v45_v15, 16  ;;  %v60_v23 = vshrl.u32 %v46_v16, 16  ;;  %v1576_v24 = vld [vmem:[%s1834_s3 + $0x18] sm:$0xff]   ;;  %vm1585_vm8 = vmand %vm91_vm1, %vm37_vm4 }
   0x9   :  { %1335 = vmatprep.subr.bf16.mxu1 %v1424_v5  ;;  %v63_v25 = vshll.u32 %v46_v16, 16  ;;  %v69_v26 = vshrl.u32 %v47_v19, 16  ;;  %v72_v27 = vshll.u32 %v47_v19, 16  ;;  %v77_v28 = vshrl.u32 %v48_v20, 16  ;;  %vm1618_vm15 = vmor %vm362_vm12, %vm363_vm13 }
   0xa   :  { %v54_v29 = vrot.slane %v52_v21, 7  ;;  %v62_v30 = vrot.slane %v60_v23, 7  ;;  %v80_v31 = vshll.u32 %v48_v20, 16  ;;  %vm123_vm11 = vsmask.f32 7440 }
   0xb   :  { %1324 = vmatpush3.bf16.msra.mxu0 %v1423_v4  ;;  %v71_v33 = vrot.slane %v69_v26, 7  ;;  %v79_v34 = vrot.slane %v77_v28, 7  ;;  %vm1611_vm14 = vmor %vm122_vm10, %vm123_vm11 }
   0xc   :  { %1336 = vmatpush3.bf16.msra.mxu1 %v1424_v5  ;;  %1325 = vmatprep.subr.bf16.mxu0 %v1425_v6  ;;  %v57_v35 = vor.u32 %v55_v22, %v54_v29  ;;  %v58_v36 = vrot.slane %v54_v29, 4  ;;  %v65_v37 = vor.u32 %v63_v25, %v62_v30  ;;  %v67_v38 = vrot.slane %v62_v30, 4 }
   0xd   :  { %1337 = vmatprep.subr.bf16.mxu1 %v1426_v7  ;;  %v74_v40 = vor.u32 %v72_v27, %v71_v33  ;;  %v75_v41 = vrot.slane %v71_v33, 4  ;;  %v82_v42 = vor.u32 %v80_v31, %v79_v34  ;;  %v84_v43 = vrot.slane %v79_v34, 4  ;;  %v93_v45 = vld [vmem:[#allocation2] sm:$0xf]  ;;  %v101_v46 = vld [vmem:[#allocation2 + $0xc] sm:$0xf] }
   0xe   :  { %v66_v44 = vsel %vm1579_vm7, %v58_v36, %v65_v37  ;;  %v94_v48 = vsel %vm1585_vm8, %v57_v35, %v93_v45  ;;  %v98_v49 = vld [vmem:[#allocation2 + $0x8] sm:$0x1] }
   0xf   :  { %1326 = vmatpush3.bf16.msra.mxu0 %v1425_v6  ;;  %v83_v47 = vsel %vm1579_vm7, %v75_v41, %v82_v42  ;;  %97 = vst.msk [vmem:[#allocation2 + $0x4] sm:$0xf] %vm91_vm1, %v66_v44  ;;  %v102_v50 = vsel %vm1585_vm8, %v74_v40, %v101_v46  ;;  %v105_v51 = vld [vmem:[#allocation2 + $0x14] sm:$0x1]  ;;  %95 = vst [vmem:[#allocation2] sm:$0xf] %v94_v48  ;;  %v99_v52 = vsel %vm1551_vm3, %v67_v38, %v98_v49 }
  0x10   :  { %1338 = vmatpush3.bf16.msra.mxu1 %v1426_v7  ;;  %1343 = vmatprep.subr.bf16.mxu0 %v1576_v24  ;;  %104 = vst.msk [vmem:[#allocation2 + $0x10] sm:$0xf] %vm91_vm1, %v83_v47  ;;  %103 = vst [vmem:[#allocation2 + $0xc] sm:$0xf] %v102_v50  ;;  %v106_v53 = vsel %vm1551_vm3, %v84_v43, %v105_v51  ;;  %v1430_v40 = vld [vmem:[%s1834_s3 + $0x10] sm:$0xff]   ;;  %v1431_v46 = vld [vmem:[%s1834_s3 + $0x8] sm:$0xff]  }
  0x11   :  { %100 = vst [vmem:[#allocation2 + $0x8] sm:$0x1] %v99_v52  ;;  %107 = vst [vmem:[#allocation2 + $0x14] sm:$0x1] %v106_v53 }
  0x16   :  { %v109_v54 = vld [vmem:[#allocation2 + $0x4] sm:$0xf]  ;;  %v108_v55 = vld [vmem:[#allocation2] sm:$0xf] }
  0x17   :  { %v135_v56 = vshll.u32 %v109_v54, 16  ;;  %v139_v57 = vshrl.u32 %v109_v54, 16  ;;  %v110_v58 = vld [vmem:[#allocation2 + $0xc] sm:$0xf]  ;;  %v126_v60 = vshrl.u32 %v108_v55, 16  ;;  %v129_v61 = vshll.u32 %v108_v55, 16 }
  0x18   :  { %v120_v59 = vld [vmem:[#allocation2 + $0x8] sm:$0x1]  ;;  %v1213_v62 = vcombine.low %v108_v55, %v109_v54  ;;  %v1604_v63 = vld [vmem:[#allocation2 + $0x10] sm:$0xf]  ;;  %v121_v3 = vld [vmem:[#allocation2 + $0x14] sm:$0x1] }
  0x19   :  { %v137_v0 = vrot.slane %v135_v56, 5  ;;  %v141_v1 = vrot.slane %v139_v57, 4  ;;  %v145_v2 = vshll.u32 %v120_v59, 16  ;;  %v128_v4 = vrot.slane %v126_v60, 4  ;;  %v356_v12 = vld [vmem:[#allocation2] sm:$0xe] }
  0x1a   :  { %v131_v5 = vrot.slane %v129_v61, 5  ;;  %1339 = vmatprep.mubr.msk.bf16.mxu1 %vm211_vm9, %v1213_v62  ;;  %v150_v6 = vshrl.u32 %v110_v58, 16  ;;  %v153_v7 = vshll.u32 %v110_v58, 16  ;;  %v159_v10 = vshll.u32 %v1604_v63, 16  ;;  %v357_v47 = vld [vmem:[#allocation2 + $0xc] sm:$0xe] }
  0x1b   :  { %v142_v8 = vor.u32 %v141_v1, %v137_v0  ;;  %v147_v9 = vrot.slane %v145_v2, 5  ;;  %v163_v11 = vshrl.u32 %v1604_v63, 16  ;;  %v169_v17 = vshll.u32 %v121_v3, 16 }
  0x1c   :  { %v132_v14 = vor.u32 %v131_v5, %v128_v4  ;;  %v152_v15 = vrot.slane %v150_v6, 4  ;;  %v155_v16 = vrot.slane %v153_v7, 5  ;;  %v370_v19 = vrot.slane %v120_v59, 5 }
  0x1d   :  { %v143_v18 = vrot.slane %v142_v8, 4  ;;  %v161_v20 = vrot.slane %v159_v10, 5  ;;  %v165_v21 = vrot.slane %v163_v11, 4  ;;  %v171_v25 = vrot.slane %v169_v17, 5 }
  0x1e   :  { %v133_v22 = vrot.slane %v132_v14, 4  ;;  %v156_v23 = vor.u32 %v155_v16, %v152_v15  ;;  %v1214_v26 = vcombine.low %v110_v58, %v1604_v63  ;;  %v1221_v30 = vrot.slane %v356_v12, 9 }
  0x1f   :  { %v148_v28 = vsel %vm1611_vm14, %v143_v18, %v147_v9  ;;  %v166_v29 = vor.u32 %v165_v21, %v161_v20  ;;  %v367_v31 = vrot.slane %v109_v54, 5  ;;  %v374_v41 = vrot.slane %v1604_v63, 5 }
  0x20   :  { %v138_v33 = vsel %vm1611_vm14, %v133_v22, %v137_v0  ;;  %v157_v34 = vrot.slane %v156_v23, 4  ;;  %1340 = vmatmul.mubr.msk.bf16.vlgmr.msra.gmra.mxu1 %vm211_vm9, %v1214_v26 }
  0x21   :  { %v1205_v35 = vcombine.low %v138_v33, %v148_v28  ;;  %v167_v36 = vrot.slane %v166_v29, 4  ;;  %v368_v37 = vsel %vm1618_vm15, %v1221_v30, %v367_v31  ;;  %v369_v38 = vrot.slane %v367_v31, 4 }
  0x22   :  { %v162_v39 = vsel %vm1611_vm14, %v157_v34, %v161_v20 }
  0x23   :  { %1327 = vmatprep.mubr.msk.bf16.mxu0 %vm211_vm9, %v1205_v35  ;;  %v172_v42 = vsel %vm1611_vm14, %v167_v36, %v171_v25  ;;  %v371_v43 = vsel %vm1618_vm15, %v369_v38, %v370_v19 }
  0x24   :  { %v1206_v44 = vcombine.low %v162_v39, %v172_v42  ;;  %v1223_v45 = vcombine.low %v368_v37, %v371_v43 }
  0x26   :  { %1328 = vmatmul.mubr.msk.bf16.vlgmr.msra.gmra.mxu0 %vm211_vm9, %v1206_v44 }
  0x27   :  { %1344 = vmatpush3.bf16.msra.mxu0 %v1576_v24  ;;  %1351 = vmatprep.mubr.msk.bf16.mxu0 %vm211_vm9, %v1223_v45 }
  0x28   :  { %1345 = vmatprep.subr.bf16.mxu0 %v1430_v40 }
  0x29   :  { %12 = vsyncpa [#allocation5], 0  ;;  %v377_v48 = vrot.slane %v121_v3, 5  ;;  %v1222_v49 = vrot.slane %v357_v47, 9  ;;  %v376_v50 = vrot.slane %v374_v41, 4  ;;  %v1432_v51 = vld [vmem:[%s1834_s3] sm:$0xff]  }
  0x2a   :  { %v1433_v54 = vld [vmem:[%s1835_s4 + $0x38] sm:$0xff]   ;;  %vm488_vm0 = vcmask 1040384   ;;  %v1434_v55 = vld [vmem:[%s1835_s4 + $0x30] sm:$0xff]   ;;  %v493_v57 = vld [vmem:[#allocation3 + $0xc] sm:$0x1]  ;;  %vm555_vm8 = vcmask 1043456  }
  0x2b   :  { %1346 = vmatpush3.bf16.msra.mxu0 %v1430_v40  ;;  %v375_v52 = vsel %vm1618_vm15, %v1222_v49, %v374_v41  ;;  %v378_v24 = vsel %vm1618_vm15, %v376_v50, %v377_v48  ;;  %vm1661_vm1 = vmand %vm488_vm0, %vm29_vm2  ;;  %v490_v59 = vld [vmem:[#allocation3] sm:$0x1]  ;;  %v1436_v62 = vld [vmem:[%s1835_s4 + $0x28] sm:$0xff]   ;;  %vm1166_vm12 = vcmask 1042434   ;;  %vm1168_vm13 = vcmask 1043459  }
  0x2c   :  { %1347 = vmatprep.subr.bf16.mxu0 %v1431_v46  ;;  %v1224_v53 = vcombine.low %v375_v52, %v378_v24  ;;  %v494_v58 = vsel %vm1661_vm1, 0, %v493_v57  ;;  %v491_v60 = vsel %vm1661_vm1, 0, %v490_v59  ;;  %v1435_v61 = vld [vmem:[%s1836_s5 + $0x38] sm:$0xff]   ;;  %vm496_vm2 = vmand %vm488_vm0, %vm37_vm4  ;;  %v500_v63 = vld [vmem:[#allocation3 + $0x14] sm:$0x1]  ;;  %vm1172_vm0 = vcmask 1045509  }
  0x2d   :  { %495 = vst [vmem:[#allocation3 + $0xc] sm:$0x1] %v494_v58  ;;  %492 = vst [vmem:[#allocation3] sm:$0x1] %v491_v60  ;;  %v501_v0 = vsel %vm496_vm2, 0, %v500_v63  ;;  %1355 = vmatprep.subr.bf16.mxu1 %v1435_v61  ;;  %v1437_v2 = vld [vmem:[%s1836_s5 + $0x30] sm:$0xff]  }
  0x2e   :  { %502 = vst [vmem:[#allocation3 + $0x14] sm:$0x1] %v501_v0  ;;  %1356 = vmatpush3.bf16.msra.mxu1 %v1435_v61  ;;  %v497_v1 = vld [vmem:[#allocation3 + $0x8] sm:$0x1]  ;;  %v1439_v5 = vld [vmem:[%s1836_s5 + $0x28] sm:$0xff]   ;;  %v1440_v6 = vld [vmem:[%s1835_s4 + $0x18] sm:$0xff]  }
  0x2f   :  { %1348 = vmatpush3.bf16.msra.mxu0 %v1431_v46  ;;  %v1438_v3 = vld [vmem:[%s1835_s4 + $0x20] sm:$0xff]   ;;  %v498_v4 = vsel %vm496_vm2, 0, %v497_v1  ;;  %1357 = vmatprep.subr.bf16.mxu1 %v1437_v2  ;;  %v1442_v8 = vld [vmem:[%s1835_s4 + $0x10] sm:$0xff]   ;;  %v1443_v9 = vld [vmem:[%s1836_s5 + $0x18] sm:$0xff]   ;;  %vm1174_vm2 = vcmask 1046534  }
  0x30   :  { %1349 = vmatprep.subr.bf16.mxu0 %v1432_v51  ;;  %499 = vst [vmem:[#allocation3 + $0x8] sm:$0x1] %v498_v4  ;;  %v1441_v7 = vld [vmem:[%s1836_s5 + $0x20] sm:$0xff]   ;;  %v1444_v10 = vld [vmem:[%s1835_s4 + $0x8] sm:$0xff]   ;;  %v1445_v11 = vld [vmem:[%s1836_s5 + $0x10] sm:$0xff]  }
  0x31   :  { %v1446_v12 = vld [vmem:[%s1835_s4] sm:$0xff]   ;;  %v1448_v14 = vld [vmem:[%s1836_s5 + $0x8] sm:$0xff]   ;;  %v1715_v16 = vld [vmem:[%s1837_s6 + $0x38] sm:$0xff]  }
  0x32   :  { %1358 = vmatpush3.bf16.msra.mxu1 %v1437_v2  ;;  %v1450_v15 = vld [vmem:[%s1836_s5] sm:$0xff]   ;;  %vm1719_vm11 = vmand %vm555_vm8, %vm37_vm4  ;;  %v1453_v13 = vld [vmem:[%s1837_s6 + $0x28] sm:$0xff]  }
  0x33   :  { %1350 = vmatpush3.bf16.msra.mxu0 %v1432_v51  ;;  %1359 = vmatprep.subr.bf16.mxu1 %v1439_v5 }
  0x34   :  { %1375 = vmatprep.subr.bf16.mxu0 %v1433_v54  ;;  %v557_v61 = vld [vmem:[#allocation3] sm:$0xf] }
  0x36   :  { %1352 = vmatmul.mubr.msk.bf16.vlgmr.msra.gmra.mxu0 %vm211_vm9, %v1224_v53  ;;  %1360 = vmatpush3.bf16.msra.mxu1 %v1439_v5 }
  0x37   :  { %1376 = vmatpush3.bf16.msra.mxu0 %v1433_v54  ;;  %1361 = vmatprep.subr.bf16.mxu1 %v1441_v7  ;;  %v564_v54 = vld [vmem:[#allocation3 + $0xc] sm:$0xf] }
  0x38   :  { %1377 = vmatprep.subr.bf16.mxu0 %v1434_v55 }
  0x3a   :  { %1362 = vmatpush3.bf16.msra.mxu1 %v1441_v7 }
  0x3b   :  { %1378 = vmatpush3.bf16.msra.mxu0 %v1434_v55  ;;  %1363 = vmatprep.subr.bf16.mxu1 %v1443_v9 }
  0x3c   :  { %1379 = vmatprep.subr.bf16.mxu0 %v1436_v62 }
  0x3e   :  { %1364 = vmatpush3.bf16.msra.mxu1 %v1443_v9 }
  0x3f   :  { %1380 = vmatpush3.bf16.msra.mxu0 %v1436_v62  ;;  %1365 = vmatprep.subr.bf16.mxu1 %v1445_v11 }
  0x40   :  { %1381 = vmatprep.subr.bf16.mxu0 %v1438_v3 }
  0x42   :  { %1366 = vmatpush3.bf16.msra.mxu1 %v1445_v11 }
  0x43   :  { %1382 = vmatpush3.bf16.msra.mxu0 %v1438_v3  ;;  %1367 = vmatprep.subr.bf16.mxu1 %v1448_v14  ;;  %v568_v3 = vld [vmem:[#allocation3 + $0x14] sm:$0x1] }
  0x44   :  { %1383 = vmatprep.subr.bf16.mxu0 %v1440_v6 }
  0x46   :  { %1368 = vmatpush3.bf16.msra.mxu1 %v1448_v14  ;;  %v561_v14 = vld [vmem:[#allocation3 + $0x8] sm:$0x1] }
  0x47   :  { %1384 = vmatpush3.bf16.msra.mxu0 %v1440_v6  ;;  %1369 = vmatprep.subr.bf16.mxu1 %v1450_v15 }
  0x48   :  { %1385 = vmatprep.subr.bf16.mxu0 %v1442_v8 }
  0x4a   :  { %1370 = vmatpush3.bf16.msra.mxu1 %v1450_v15 }
  0x4b   :  { %1386 = vmatpush3.bf16.msra.mxu0 %v1442_v8  ;;  %1395 = vmatprep.subr.bf16.mxu1 %v1715_v16 }
  0x4c   :  { %1387 = vmatprep.subr.bf16.mxu0 %v1444_v10 }
  0x4f   :  { %1388 = vmatpush3.bf16.msra.mxu0 %v1444_v10 }
  0x50   :  { %1389 = vmatprep.subr.bf16.mxu0 %v1446_v12 }
  0x53   :  { %1390 = vmatpush3.bf16.msra.mxu0 %v1446_v12 }
  0xe0   :  { %v1341_v18 = vpop.f32.mrf.mxu1 }
  0xe2   :  { %v341_v20 = vpop.f32.mrf.mxu1 }
  0xe4   :  { %v1342_v22 = vpop.f32.mrf.mxu1 }
  0xe6   :  { %v1329_v17 = vpop.f32.mrf.mxu0  ;;  %v344_v29 = vpop.f32.mrf.mxu1 }
  0xe7   :  { %v350_v25 = vadd.f32 %v1341_v18, %v1329_v17 }
  0xe8   :  { %v252_v19 = vpop.f32.mrf.mxu0 }
  0xe9   :  { %v342_v28 = vadd.f32 %v341_v20, %v252_v19 }
  0xea   :  { %v1330_v21 = vpop.f32.mrf.mxu0 }
  0xeb   :  { %v353_v33 = vadd.f32 %v1342_v22, %v1330_v21 }
  0xec   :  { %v255_v23 = vpop.f32.mrf.mxu0 }
  0xed   :  { %v345_v36 = vadd.f32 %v344_v29, %v255_v23 }
  0xf6   :  { %v1353_v26 = vpop.f32.mrf.mxu0 }
  0xf7   :  { %v474_v30 = vadd.f32 %v1353_v26, %v350_v25 }
  0xf8   :  { %v457_v31 = vpop.f32.mrf.mxu0 }
  0xf9   :  { %vm478_vm3 = vcmp.gt.f32.partialorder %v474_v30, 0.0  ;;  %v482_v34 = vmul.f32 0.1, %v474_v30  ;;  %v472_v35 = vadd.f32 %v457_v31, %v342_v28 }
  0xfa   :  { %v1354_v37 = vpop.f32.mrf.mxu0 }
  0xfb   :  { %v486_v38 = vsel %vm478_vm3, %v474_v30, %v482_v34  ;;  %vm476_vm5 = vcmp.gt.f32.partialorder %v472_v35, 0.0  ;;  %v480_v39 = vmul.f32 0.1, %v472_v35  ;;  %v475_v40 = vadd.f32 %v1354_v37, %v353_v33 }
  0xfc   :  { %v1269_v41 = vpack.c.bf16 %v486_v38, %v486_v38  ;;  %v460_v42 = vpop.f32.mrf.mxu0  ;;  %vm1176_vm3 = vcmask 1047559  }
  0xfd   :  { %v484_v43 = vsel %vm476_vm5, %v472_v35, %v480_v39  ;;  %vm479_vm6 = vcmp.gt.f32.partialorder %v475_v40, 0.0  ;;  %v483_v44 = vmul.f32 0.1, %v475_v40  ;;  %v473_v45 = vadd.f32 %v460_v42, %v345_v36 }
  0xfe   :  { %v533_v46 = vshrl.u32 %v1269_v41, 16  ;;  %v1267_v47 = vpack.c.bf16 %v484_v43, %v484_v43  ;;  %v536_v51 = vshll.u32 %v1269_v41, 16 }
  0xff   :  { %v487_v48 = vsel %vm479_vm6, %v475_v40, %v483_v44  ;;  %vm477_vm10 = vcmp.gt.f32.partialorder %v473_v45, 0.0  ;;  %v481_v49 = vmul.f32 0.1, %v473_v45 }
 0x100   :  { %v535_v50 = vrot.slane %v533_v46, 7  ;;  %v516_v52 = vshrl.u32 %v1267_v47, 16  ;;  %v1270_v24 = vpack.c.bf16 %v487_v48, %v487_v48  ;;  %v519_v59 = vshll.u32 %v1267_v47, 16 }
 0x101   :  { %v485_v55 = vsel %vm477_vm10, %v473_v45, %v481_v49 }
 0x102   :  { %v538_v57 = vor.u32 %v536_v51, %v535_v50  ;;  %v518_v58 = vrot.slane %v516_v52, 7  ;;  %v541_v60 = vshrl.u32 %v1270_v24, 16  ;;  %v1268_v62 = vpack.c.bf16 %v485_v55, %v485_v55 }
 0x103   :  { %v544_v2 = vshll.u32 %v1270_v24, 16  ;;  %v539_v5 = vrot.slane %v535_v50, 4 }
 0x104   :  { %v565_v63 = vsel %vm1719_vm11, %v538_v57, %v564_v54  ;;  %v521_v0 = vor.u32 %v519_v59, %v518_v58  ;;  %v543_v1 = vrot.slane %v541_v60, 7  ;;  %v524_v4 = vshrl.u32 %v1268_v62, 16 }
 0x105   :  { %566 = vst [vmem:[#allocation3 + $0xc] sm:$0xf] %v565_v63  ;;  %v527_v10 = vshll.u32 %v1268_v62, 16  ;;  %v522_v15 = vrot.slane %v518_v58, 4 }
 0x106   :  { %v558_v6 = vsel %vm1719_vm11, %v521_v0, %v557_v61  ;;  %v546_v7 = vor.u32 %v544_v2, %v543_v1  ;;  %v548_v8 = vrot.slane %v543_v1, 4  ;;  %v526_v9 = vrot.slane %v524_v4, 7 }
 0x107   :  { %559 = vst [vmem:[#allocation3] sm:$0xf] %v558_v6 }
 0x108   :  { %v547_v11 = vsel %vm1579_vm7, %v539_v5, %v546_v7  ;;  %v569_v12 = vsel %vm1661_vm1, %v548_v8, %v568_v3  ;;  %v529_v17 = vor.u32 %v527_v10, %v526_v9  ;;  %v531_v18 = vrot.slane %v526_v9, 4  ;;  %v1452_v7 = vld [vmem:[%s1837_s6 + $0x30] sm:$0xff]   ;;  %v1454_v9 = vld [vmem:[%s1837_s6 + $0x20] sm:$0xff]   ;;  %v1455_v10 = vld [vmem:[%s1837_s6 + $0x18] sm:$0xff]  }
 0x109   :  { %567 = vst [vmem:[#allocation3 + $0x10] sm:$0xf] %v547_v11  ;;  %570 = vst [vmem:[#allocation3 + $0x14] sm:$0x1] %v569_v12  ;;  %v1457_v11 = vld [vmem:[%s1837_s6 + $0x8] sm:$0xff]  }
 0x10a   :  { %v530_v19 = vsel %vm1579_vm7, %v522_v15, %v529_v17  ;;  %v562_v20 = vsel %vm1661_vm1, %v531_v18, %v561_v14  ;;  %v1458_v14 = vld [vmem:[%s1837_s6] sm:$0xff]   ;;  %vm1164_vm7 = vcmask 1041409  }
 0x10b   :  { %560 = vst [vmem:[#allocation3 + $0x4] sm:$0xf] %v530_v19  ;;  %563 = vst [vmem:[#allocation3 + $0x8] sm:$0x1] %v562_v20 }
 0x10c   :  { %v573_v21 = vld [vmem:[#allocation3 + $0xc] sm:$0xf] }
 0x10d   :  { %v618_v22 = vshrl.u32 %v573_v21, 16  ;;  %v621_v23 = vshll.u32 %v573_v21, 16  ;;  %v872_v17 = vld [vmem:[#allocation3 + $0xc] sm:$0xe] }
 0x10e   :  { %v571_v25 = vld [vmem:[#allocation3] sm:$0xf]  ;;  %v1256_v19 = vrot.slane %v872_v17, 9 }
 0x10f   :  { %v594_v26 = vshrl.u32 %v571_v25, 16  ;;  %v597_v28 = vshll.u32 %v571_v25, 16  ;;  %v620_v30 = vrot.slane %v618_v22, 4  ;;  %v623_v34 = vrot.slane %v621_v23, 5  ;;  %v871_v58 = vld [vmem:[#allocation3] sm:$0xe] }
 0x110   :  { %v1735_v29 = vld [vmem:[#allocation3 + $0x10] sm:$0xf]  ;;  %v1738_v35 = vld [vmem:[#allocation3 + $0x14] sm:$0x1]  ;;  %v1255_v1 = vrot.slane %v871_v58, 9 }
 0x111   :  { %v596_v31 = vrot.slane %v594_v26, 4  ;;  %v599_v33 = vrot.slane %v597_v28, 5  ;;  %v631_v32 = vshrl.u32 %v1735_v29, 16  ;;  %v627_v56 = vshll.u32 %v1735_v29, 16 }
 0x112   :  { %v572_v36 = vld [vmem:[#allocation3 + $0x4] sm:$0xf]  ;;  %v591_v37 = vld [vmem:[#allocation3 + $0x8] sm:$0x1]  ;;  %v1246_v43 = vcombine.low %v573_v21, %v1735_v29  ;;  %v624_v44 = vor.u32 %v623_v34, %v620_v30  ;;  %v637_v46 = vshll.u32 %v1738_v35, 16  ;;  %v886_v12 = vrot.slane %v1735_v29, 5 }
 0x113   :  { %v633_v38 = vrot.slane %v631_v32, 4  ;;  %v607_v39 = vshrl.u32 %v572_v36, 16  ;;  %v1245_v40 = vcombine.low %v571_v25, %v572_v36  ;;  %v600_v41 = vor.u32 %v599_v33, %v596_v31 }
 0x114   :  { %v603_v42 = vshll.u32 %v572_v36, 16  ;;  %v629_v45 = vrot.slane %v627_v56, 5  ;;  %v613_v49 = vshll.u32 %v591_v37, 16  ;;  %v879_v50 = vrot.slane %v572_v36, 5 }
 0x115   :  { %1391 = vmatprep.mubr.bf16.mxu0 %v1245_v40  ;;  %v609_v48 = vrot.slane %v607_v39, 4  ;;  %v601_v52 = vrot.slane %v600_v41, 4  ;;  %v625_v54 = vrot.slane %v624_v44, 4  ;;  %v639_v57 = vrot.slane %v637_v46, 5 }
 0x116   :  { %v605_v47 = vrot.slane %v603_v42, 5  ;;  %1392 = vmatmul.mubr.bf16.vlgmr.msra.gmra.mxu0 %v1246_v43  ;;  %v634_v51 = vor.u32 %v633_v38, %v629_v45  ;;  %v881_v53 = vrot.slane %v879_v50, 4  ;;  %v615_v60 = vrot.slane %v613_v49, 5 }
 0x117   :  { %v882_v61 = vrot.slane %v591_v37, 5  ;;  %v630_v4 = vsel %vm1611_vm14, %v625_v54, %v629_v45  ;;  %v880_v6 = vsel %vm1618_vm15, %v1255_v1, %v879_v50  ;;  %v888_v15 = vrot.slane %v886_v12, 4 }
 0x118   :  { %v610_v24 = vor.u32 %v609_v48, %v605_v47  ;;  %v635_v55 = vrot.slane %v634_v51, 4  ;;  %v606_v63 = vsel %vm1611_vm14, %v601_v52, %v605_v47  ;;  %v889_v18 = vrot.slane %v1738_v35, 5 }
 0x119   :  { %v883_v2 = vsel %vm1618_vm15, %v881_v53, %v882_v61  ;;  %v887_v21 = vsel %vm1618_vm15, %v1256_v19, %v886_v12  ;;  %v1481_v29 = vmov 1983009808   ;;  %v1036_v31 = vlaneseq }
 0x11a   :  { %v611_v59 = vrot.slane %v610_v24, 4  ;;  %v640_v62 = vsel %vm1611_vm14, %v635_v55, %v639_v57  ;;  %v1257_v8 = vcombine.low %v880_v6, %v883_v2  ;;  %v890_v20 = vsel %vm1618_vm15, %v888_v15, %v889_v18 }
 0x11b   :  { %v1236_v5 = vcombine.low %v630_v4, %v640_v62  ;;  %v1258_v22 = vcombine.low %v887_v21, %v890_v20  ;;  %v1034_v30 = vunpack.c.l.s4 %v1481_v29  ;;  %v1037_v35 = vshrl.u32 %v1036_v31, 7 }
 0x11c   :  { %v616_v0 = vsel %vm1611_vm14, %v611_v59, %v615_v60  ;;  %vm1170_vm15 = vcmask 1044484  }
 0x11d   :  { %v1235_v3 = vcombine.low %v606_v63, %v616_v0  ;;  %v1035_v32 = vunpack.c.0.s8 %v1034_v30  ;;  %v1785_v40 = vsub.s32 0, %v1037_v35 }
 0x11f   :  { %1371 = vmatprep.mubr.bf16.mxu1 %v1235_v3  ;;  %v1783_v27 = vsub.s32 %v1035_v32, %v1037_v35 }
 0x120   :  { %1372 = vmatmul.mubr.bf16.vlgmr.msra.gmra.mxu1 %v1236_v5 }
 0x121   :  { %1396 = vmatpush3.bf16.msra.mxu1 %v1715_v16  ;;  %1411 = vmatprep.mubr.bf16.mxu1 %v1257_v8  ;;  %v1456_v16 = vld [vmem:[%s1837_s6 + $0x10] sm:$0xff]   ;;  %s1482_s6 = smov [#allocation4]  }
 0x122   :  { %1397 = vmatprep.subr.bf16.mxu1 %v1452_v7  ;;  %s1194_s23 = sshll.u32 %s1482_s6, 4  ;;  %s1195_s23 = int_to_ptr.vmem [resolvable:$true] %s1194_s23 }
 0x123   :  { %s1459_s24 = scalar_lea.vmem %s1195_s23, 256  ;;  %p1464_p1 = scmp.lt.s32.totalorder %s1195_s23, %s1195_s23 }
 0x124   :  { %p1460_p0 = scmp.ne.s32.totalorder %s1195_s23, %s1459_s24  ;;  %p1465_p2 = scmp.lt.s32.totalorder %s1459_s24, %s1459_s24 }
 0x125   :  { %1398 = vmatpush3.bf16.msra.mxu1 %v1452_v7 }
 0x126   :  { %1399 = vmatprep.subr.bf16.mxu1 %v1453_v13  ;;  %p1466_p3 = por %p1465_p2, %p1464_p1 }
 0x128   :  { %p1467_p4 = pnand %p1466_p3, %p1460_p0 }
 0x129   :  { %1400 = vmatpush3.bf16.msra.mxu1 %v1453_v13 }
 0x12a   :  { %1401 = vmatprep.subr.bf16.mxu1 %v1454_v9 }
 0x12d   :  { %1402 = vmatpush3.bf16.msra.mxu1 %v1454_v9 }
 0x12e   :  { %1403 = vmatprep.subr.bf16.mxu1 %v1455_v10 }
 0x131   :  { %1404 = vmatpush3.bf16.msra.mxu1 %v1455_v10 }
 0x132   :  { %1405 = vmatprep.subr.bf16.mxu1 %v1456_v16 }
 0x135   :  { %1406 = vmatpush3.bf16.msra.mxu1 %v1456_v16 }
 0x136   :  { %1407 = vmatprep.subr.bf16.mxu1 %v1457_v11 }
 0x139   :  { %1408 = vmatpush3.bf16.msra.mxu1 %v1457_v11 }
 0x13a   :  { %1409 = vmatprep.subr.bf16.mxu1 %v1458_v14 }
 0x13d   :  { %1410 = vmatpush3.bf16.msra.mxu1 %v1458_v14 }
 0x140   :  { %1412 = vmatmul.mubr.bf16.vlgmr.msra.gmra.mxu1 %v1258_v22 }
 0x1d6   :  { %v1393_v26 = vpop.f32.mrf.mxu0 }
 0x1d8   :  { %v856_v33 = vpop.f32.mrf.mxu0 }
 0x1da   :  { %v1394_v56 = vpop.f32.mrf.mxu0 }
 0x1dc   :  { %v859_v42 = vpop.f32.mrf.mxu0 }
 0x1e0   :  { %v1373_v23 = vpop.f32.mrf.mxu1 }
 0x1e1   :  { %v865_v36 = vadd.f32 %v1393_v26, %v1373_v23 }
 0x1e2   :  { %v747_v25 = vpop.f32.mrf.mxu1 }
 0x1e3   :  { %v857_v38 = vadd.f32 %v856_v33, %v747_v25 }
 0x1e4   :  { %v1374_v28 = vpop.f32.mrf.mxu1 }
 0x1e5   :  { %v868_v43 = vadd.f32 %v1394_v56, %v1374_v28 }
 0x1e6   :  { %v750_v34 = vpop.f32.mrf.mxu1 }
 0x1e7   :  { %v860_v46 = vadd.f32 %v859_v42, %v750_v34 }
 0x200   :  { %v1413_v37 = vpop.f32.mrf.mxu1 }
 0x201   :  { %v1014_v39 = vadd.f32 %v1413_v37, %v865_v36 }
 0x202   :  { %v997_v41 = vpop.f32.mrf.mxu1 }
 0x203   :  { %vm1018_vm4 = vcmp.gt.f32.partialorder %v1014_v39, 0.0  ;;  %v1022_v44 = vmul.f32 0.1, %v1014_v39  ;;  %v1012_v45 = vadd.f32 %v997_v41, %v857_v38 }
 0x204   :  { %v1414_v47 = vpop.f32.mrf.mxu1 }
 0x205   :  { %v1026_v48 = vsel %vm1018_vm4, %v1014_v39, %v1022_v44  ;;  %vm1016_vm14 = vcmp.gt.f32.partialorder %v1012_v45, 0.0  ;;  %v1020_v49 = vmul.f32 0.1, %v1012_v45  ;;  %v1015_v50 = vadd.f32 %v1414_v47, %v868_v43 }
 0x206   :  { %v1066_v51 = vcombine.high %v1026_v48, %v1026_v48  ;;  %v1073_v52 = vrot.slane %v1026_v48, %v1783_v27  ;;  %v1000_v24 = vpop.f32.mrf.mxu1 }
 0x207   :  { %v1024_v53 = vsel %vm1016_vm14, %v1012_v45, %v1020_v49  ;;  %vm1019_vm1 = vcmp.gt.f32.partialorder %v1015_v50, 0.0  ;;  %v1023_v54 = vmul.f32 0.1, %v1015_v50  ;;  %v1013_v55 = vadd.f32 %v1000_v24, %v860_v46 }
 0x208   :  { %v1080_v57 = vrot.slane %v1066_v51, %v1783_v27  ;;  %v1081_v58 = vcombine.high %v1073_v52, %v1073_v52  ;;  %v1135_v59 = vrot.slane %v1073_v52, %v1785_v40  ;;  %v1032_v60 = vcombine.high %v1024_v53, %v1024_v53 }
 0x209   :  { %v1039_v61 = vrot.slane %v1024_v53, %v1783_v27  ;;  %v1027_v62 = vsel %vm1019_vm1, %v1015_v50, %v1023_v54  ;;  %vm1017_vm5 = vcmp.gt.f32.partialorder %v1013_v55, 0.0  ;;  %v1021_v63 = vmul.f32 0.1, %v1013_v55 }
 0x20a   :  { %v1082_v0 = vcombine.high %v1080_v57, %v1080_v57  ;;  %v1139_v1 = vrot.slane %v1081_v58, %v1785_v40  ;;  %v1143_v2 = vrot.slane %v1080_v57, %v1785_v40  ;;  %v1046_v3 = vrot.slane %v1032_v60, %v1783_v27 }
 0x20b   :  { %v1047_v4 = vcombine.high %v1039_v61, %v1039_v61  ;;  %v1103_v5 = vrot.slane %v1039_v61, %v1785_v40  ;;  %v1083_v6 = vcombine.high %v1027_v62, %v1027_v62  ;;  %v1090_v7 = vrot.slane %v1027_v62, %v1783_v27 }
 0x20c   :  { %v1147_v8 = vrot.slane %v1082_v0, %v1785_v40  ;;  %v1178_v13 = vsel %vm1164_vm7, %v1139_v1, %v1135_v59  ;;  %v1048_v9 = vcombine.high %v1046_v3, %v1046_v3  ;;  %v1111_v10 = vrot.slane %v1046_v3, %v1785_v40 }
 0x20d   :  { %v1179_v16 = vsel %vm1166_vm12, %v1143_v2, %v1178_v13  ;;  %v1107_v11 = vrot.slane %v1047_v4, %v1785_v40  ;;  %v1097_v12 = vrot.slane %v1083_v6, %v1783_v27  ;;  %v1098_v14 = vcombine.high %v1090_v7, %v1090_v7 }
 0x20e   :  { %v1115_v15 = vrot.slane %v1048_v9, %v1785_v40  ;;  %v1151_v17 = vrot.slane %v1090_v7, %v1785_v40  ;;  %v1180_v18 = vsel %vm1168_vm13, %v1147_v8, %v1179_v16  ;;  %v1025_v19 = vsel %vm1017_vm5, %v1013_v55, %v1021_v63 }
 0x20f   :  { %v1165_v20 = vsel %vm1164_vm7, %v1107_v11, %v1103_v5  ;;  %v1099_v21 = vcombine.high %v1097_v12, %v1097_v12  ;;  %v1155_v22 = vrot.slane %v1098_v14, %v1785_v40  ;;  %v1159_v23 = vrot.slane %v1097_v12, %v1785_v40 }
 0x210   :  { %v1167_v25 = vsel %vm1166_vm12, %v1111_v10, %v1165_v20  ;;  %v1181_v26 = vsel %vm1170_vm15, %v1151_v17, %v1180_v18  ;;  %v1049_v28 = vcombine.high %v1025_v19, %v1025_v19  ;;  %v1056_v29 = vrot.slane %v1025_v19, %v1783_v27 }
 0x211   :  { %v1163_v30 = vrot.slane %v1099_v21, %v1785_v40  ;;  %v1169_v31 = vsel %vm1168_vm13, %v1115_v15, %v1167_v25  ;;  %v1182_v33 = vsel %vm1172_vm0, %v1155_v22, %v1181_v26 }
 0x212   :  { %v1063_v34 = vrot.slane %v1049_v28, %v1783_v27  ;;  %v1064_v32 = vcombine.high %v1056_v29, %v1056_v29  ;;  %v1119_v35 = vrot.slane %v1056_v29, %v1785_v40  ;;  %v1183_v56 = vsel %vm1174_vm2, %v1159_v23, %v1182_v33 }
 0x213   :  { %v1184_v36 = vsel %vm1176_vm3, %v1163_v30, %v1183_v56 }
 0x214   :  { %v1065_v37 = vcombine.high %v1063_v34, %v1063_v34  ;;  %v1123_v38 = vrot.slane %v1064_v32, %v1785_v40  ;;  %v1127_v39 = vrot.slane %v1063_v34, %v1785_v40  ;;  %v1171_v41 = vsel %vm1170_vm15, %v1119_v35, %v1169_v31  ;;  %1188 = vst.msk [vmem:[#allocation4 + $0x8] sm:$0xff] %vm211_vm9, %v1184_v36 }
 0x216   :  { %v1131_v27 = vrot.slane %v1065_v37, %v1785_v40  ;;  %v1173_v42 = vsel %vm1172_vm0, %v1123_v38, %v1171_v41 }
 0x217   :  { %v1175_v43 = vsel %vm1174_vm2, %v1127_v39, %v1173_v42 }
 0x218   :  { %v1177_v44 = vsel %vm1176_vm3, %v1131_v27, %v1175_v43 }
 0x219   :  { %1187 = vst.msk [vmem:[#allocation4] sm:$0xff] %vm211_vm9, %v1177_v44 }
 0x21a   :  { %1470 = shalt.err (!%p1467_p4)
}
 0x21b   :  { %s1483_s0 = smov 128   ;;  %s1484_s25 = smov 8  }
 0x21c   :  { %1200 = dma.vmem_to_hbm [thread:$0]  %s1195_s23, 256, %s1838_s7, [#allocation5], %s1483_s0, %s1483_s0, %s1484_s25  }
 0x21d   :  { %1479 = dma.done.wait [#allocation5], 256  }
 0x21e   :  { %1480 = vsyncadd [#allocation5], 4294967040 }
 0x21f   :  { %1204 = vsyncpa [#allocation5], 1 }

</bundles_post_ra>
